<compile_context>
chip_gen: v7x
topology: tpu7x:2x2x1
jax: 0.10.0
libtpu: 0.0.40
codegen_flags: <defaults>
</compile_context>

<pallas_src>
import functools

import jax
import jax.numpy as jnp
from jax.experimental import pallas as pl
from jax.experimental.pallas import tpu as pltpu

N_CLASSES = 5
C_PAD = 128                              # lane-dense padded class dim (one vreg lane width)
MAX_TB = 1024                            # cap on batch-tile rows (keeps f32 (tb,128) temps small)
VMEM_TILE_BUDGET = 12 * 1024 * 1024      # budget for x double-buffer + in-kernel f32 temporaries


def _batch_tile(b, d):
    """Batch-tile rows: multiple of 8, sized from D and a VMEM byte budget.
    Accounts for the double-buffered (tb, D) x tile plus ~6 f32 (tb, 128)
    in-kernel temporaries (logits / mask / exp / ...)."""
    per_row_bytes = (2 * d + 6 * C_PAD) * 4
    tb = VMEM_TILE_BUDGET // per_row_bytes
    tb = max(8, min(MAX_TB, (tb // 8) * 8))
    return min(b, tb)


def _vmem_limit_bytes(tb, d):
    """Explicit scoped-VMEM request: double-buffered x + resident weight + f32 temps + slack."""
    need = (2 * tb * d + 2 * d * C_PAD + 6 * tb * C_PAD + 4 * C_PAD) * 4
    return int(min(int(need * 1.5) + (2 << 20), 100 * 1024 * 1024))


def prepare_params(w, b):
    """One-time layout change (at init, never per forward call):
    torch-style (5, D) weight -> (D, 128) zero-padded, bias (5,) -> (1, 128)."""
    n_out, d = w.shape
    w_pad = jnp.zeros((d, C_PAD), jnp.float32).at[:, :n_out].set(w.T)
    b_pad = jnp.zeros((1, C_PAD), jnp.float32).at[:, :n_out].set(b)
    # TODO(synk): on v5e with large D, optionally store w_pad (and x) as bfloat16 with
    # preferred_element_type=f32 accumulation to halve the HBM stream.
    return w_pad, b_pad


def prepare_targets(y):
    """One-time target layout: (B,) int -> (B, 1) int32 (avoids a per-step XLA copy)."""
    return y.reshape(-1, 1).astype(jnp.int32)


# ----------------------------------------------------------------------------
# Inference path: logits (B, 5) written directly, no padded HBM round-trip
# ----------------------------------------------------------------------------
def linear_kernel(x_ref, w_ref, b_ref, o_ref, *, n_classes):
    logits = (
        jnp.dot(x_ref[...], w_ref[...], preferred_element_type=jnp.float32)
        + b_ref[...]
    )
    # Store only the real classes: (tb, 5) masked vst instead of (tb, 128) + slice pass.
    o_ref[...] = logits[:, :n_classes]


def linear_forward(x, w_pad, b_pad):
    """x: (B, D) f32 -> (B, 5) f32 logits (PyTorch nn.Linear semantics)."""
    B, D = x.shape
    tb = _batch_tile(B, D)
    kernel = functools.partial(linear_kernel, n_classes=N_CLASSES)
    cost = pl.CostEstimate(
        flops=2 * B * D * C_PAD,
        transcendentals=0,
        bytes_accessed=(x.size + w_pad.size + b_pad.size + B * N_CLASSES) * 4,
    )
    return pl.pallas_call(
        kernel,
        out_shape=jax.ShapeDtypeStruct((B, N_CLASSES), jnp.float32),
        grid=(pl.cdiv(B, tb),),
        in_specs=[
            pl.BlockSpec((tb, D), lambda i: (i, 0)),
            pl.BlockSpec((D, C_PAD), lambda i: (0, 0)),
            pl.BlockSpec((1, C_PAD), lambda i: (0, 0)),
        ],
        out_specs=pl.BlockSpec((tb, N_CLASSES), lambda i: (i, 0)),
        compiler_params=pltpu.CompilerParams(
            dimension_semantics=("parallel",),
            vmem_limit_bytes=_vmem_limit_bytes(tb, D),
        ),
        cost_estimate=cost,
    )(x, w_pad, b_pad)


# ----------------------------------------------------------------------------
# Training path: fused linear + cross-entropy (per-row losses, parallel batch axis)
# ----------------------------------------------------------------------------
def fused_ce_kernel(x_ref, w_ref, b_ref, y_ref, loss_ref, *, n_classes):
    # Logits never leave the chip: (tb, 128) f32 straight out of the MXU.
    logits = (
        jnp.dot(x_ref[...], w_ref[...], preferred_element_type=jnp.float32)
        + b_ref[...]
    )

    classes = jax.lax.broadcasted_iota(jnp.int32, logits.shape, 1)     # (tb, 128)
    valid_c = classes < n_classes
    masked = jnp.where(valid_c, logits, jnp.float32(-1e30))            # padded cols -> -inf-ish

    # logsumexp over valid classes; every intermediate stays 2-D (tb, 1).
    m = jnp.max(masked, axis=-1, keepdims=True)
    lse = m + jnp.log(jnp.sum(jnp.exp(masked - m), axis=-1, keepdims=True))

    # Target logit via compare+select+sum (y in [0, 5) never hits the padding).
    picked = jnp.sum(
        jnp.where(classes == y_ref[...], logits, jnp.float32(0.0)),
        axis=-1, keepdims=True,
    )

    # Per-row loss. Rows past B in an edge block are simply never written back,
    # so no tail masking / accumulator / scalar transfer is needed.
    loss_ref[...] = lse - picked


def fused_ce_loss(x, w_pad, b_pad, y2d):
    """x: (B, D) f32, y2d: (B, 1) int32 -> scalar f32 mean cross-entropy loss."""
    B, D = x.shape
    tb = _batch_tile(B, D)
    kernel = functools.partial(fused_ce_kernel, n_classes=N_CLASSES)
    cost = pl.CostEstimate(
        flops=2 * B * D * C_PAD + 8 * B * C_PAD,
        transcendentals=B * C_PAD + B,              # exp + log
        bytes_accessed=(x.size + w_pad.size + b_pad.size + y2d.size + B) * 4,
    )
    per_row = pl.pallas_call(
        kernel,
        out_shape=jax.ShapeDtypeStruct((B, 1), jnp.float32),
        grid=(pl.cdiv(B, tb),),
        in_specs=[
            pl.BlockSpec((tb, D), lambda i: (i, 0)),
            pl.BlockSpec((D, C_PAD), lambda i: (0, 0)),
            pl.BlockSpec((1, C_PAD), lambda i: (0, 0)),
            pl.BlockSpec((tb, 1), lambda i: (i, 0)),
        ],
        out_specs=pl.BlockSpec((tb, 1), lambda i: (i, 0)),
        # Batch axis is fully independent now -> "parallel" (2x on v7x megacore).
        compiler_params=pltpu.CompilerParams(
            dimension_semantics=("parallel",),
            vmem_limit_bytes=_vmem_limit_bytes(tb, D),
        ),
        cost_estimate=cost,
    )(x, w_pad, b_pad, y2d)
    # Trivial final mean outside the kernel (B floats).
    return jnp.sum(per_row) / jnp.float32(B)


def torch_model_forward(x, w_pad, b_pad, y2d=None):
    """Mirror of TorchModel.forward: returns CE loss if targets given, else logits."""
    if y2d is not None:
        return fused_ce_loss(x, w_pad, b_pad, y2d)
    return linear_forward(x, w_pad, b_pad)


if __name__ == "__main__":
    input_size = 32
    batch = 8

    key = jax.random.PRNGKey(0)
    kx, kw, kb, ky = jax.random.split(key, 4)

    # Parameter init matching nn.Linear(input_size, 5) shapes.
    bound = 1.0 / jnp.sqrt(jnp.float32(input_size))
    w = jax.random.uniform(kw, (N_CLASSES, input_size), jnp.float32, -bound, bound)
    b = jax.random.uniform(kb, (N_CLASSES,), jnp.float32, -bound, bound)
    w_pad, b_pad = prepare_params(w, b)            # one-time layout change

    x = jax.random.normal(kx, (batch, input_size), jnp.float32)
    y = jax.random.randint(ky, (batch,), 0, N_CLASSES, jnp.int32)
    y2d = prepare_targets(y)                       # one-time target layout

    # Inference path (y is None): returns logits.
    logits = torch_model_forward(x, w_pad, b_pad)
    logits = jax.block_until_ready(logits)

    # Training path (y given): returns scalar cross-entropy loss.
    loss = torch_model_forward(x, w_pad, b_pad, y2d)
    loss = jax.block_until_ready(loss)

    # Sanity check against pure-JAX reference (PyTorch semantics).
    ref_logits = x @ w.T + b
    ref_loss = jnp.mean(
        jax.nn.logsumexp(ref_logits, axis=-1)
        - jnp.take_along_axis(ref_logits, y[:, None], axis=-1)[:, 0]
    )
    assert logits.shape == (batch, N_CLASSES)
    assert jnp.allclose(logits, ref_logits, atol=1e-5)
    assert jnp.allclose(loss, ref_loss, atol=1e-5)

    print("KERNEL_OK")
</pallas_src>

<mosaic_0001>
module attributes {stable_mosaic.version = 11 : i64} {
  func.func @linear_kernel(%arg0: i32, %arg1: memref<8x32xf32, #tpu.memory_space<vmem>>, %arg2: memref<32x128xf32, #tpu.memory_space<vmem>>, %arg3: memref<1x128xf32, #tpu.memory_space<vmem>>, %arg4: memref<8x5xf32, #tpu.memory_space<vmem>>) attributes {dimension_semantics = [#tpu.dimension_semantics<parallel>], iteration_bounds = array<i64: 1>, scalar_prefetch = 0 : i64, scratch_operands = 0 : i64, tpu.core_type = #tpu.core_type<tc>, window_params = [{transform_indices = @transform_0, window_bounds = array<i64: 8, 32>}, {pipeline_mode = #tpu.pipeline_mode<synchronous>, transform_indices = @transform_1, window_bounds = array<i64: 32, 128>}, {pipeline_mode = #tpu.pipeline_mode<synchronous>, transform_indices = @transform_2, window_bounds = array<i64: 1, 128>}, {transform_indices = @transform_3, window_bounds = array<i64: 8, 5>}]} {
    %c0 = arith.constant 0 : index
    %c0_0 = arith.constant 0 : index
    %0 = vector.load %arg1[%c0, %c0_0] : memref<8x32xf32, #tpu.memory_space<vmem>>, vector<8x32xf32>
    %c0_1 = arith.constant 0 : index
    %c0_2 = arith.constant 0 : index
    %1 = vector.load %arg2[%c0_1, %c0_2] : memref<32x128xf32, #tpu.memory_space<vmem>>, vector<32x128xf32>
    %cst = arith.constant dense<0.000000e+00> : vector<8x128xf32>
    %2 = tpu.matmul %0, %1, %cst {dimension_numbers = #tpu.dot_dimension_numbers<[1], [0], [0], [1], [0, 0, 1, 1], [], []>} : vector<8x32xf32>, vector<32x128xf32>, vector<8x128xf32> -> vector<8x128xf32>
    %c0_3 = arith.constant 0 : index
    %c0_4 = arith.constant 0 : index
    %3 = vector.load %arg3[%c0_3, %c0_4] : memref<1x128xf32, #tpu.memory_space<vmem>>, vector<1x128xf32>
    %4 = vector.broadcast %3 : vector<1x128xf32> to vector<8x128xf32>
    %5 = arith.addf %2, %4 : vector<8x128xf32>
    %6 = vector.extract_strided_slice %5 {offsets = [0, 0], sizes = [8, 5], strides = [1, 1]} : vector<8x128xf32> to vector<8x5xf32>
    %c0_5 = arith.constant 0 : index
    %c0_6 = arith.constant 0 : index
    %7 = vector.load %arg4[%c0_5, %c0_6] : memref<8x5xf32, #tpu.memory_space<vmem>>, vector<8x5xf32>
    tpu.vector_store %arg4[%c0_5, %c0_6], %6 {strides = array<i32>} : memref<8x5xf32, #tpu.memory_space<vmem>>, vector<8x5xf32>,
    return
  }
  func.func @transform_0(%arg0: i32) -> (i32, i32) {
    %c0_i32 = arith.constant 0 : i32
    %c0_i32_0 = arith.constant 0 : i32
    return %arg0, %c0_i32 : i32, i32
  }
  func.func @transform_1(%arg0: i32) -> (i32, i32) {
    %c0_i32 = arith.constant 0 : i32
    %c0_i32_0 = arith.constant 0 : i32
    %c0_i32_1 = arith.constant 0 : i32
    return %c0_i32, %c0_i32_0 : i32, i32
  }
  func.func @transform_2(%arg0: i32) -> (i32, i32) {
    %c0_i32 = arith.constant 0 : i32
    %c0_i32_0 = arith.constant 0 : i32
    %c0_i32_1 = arith.constant 0 : i32
    return %c0_i32, %c0_i32_0 : i32, i32
  }
  func.func @transform_3(%arg0: i32) -> (i32, i32) {
    %c0_i32 = arith.constant 0 : i32
    %c0_i32_0 = arith.constant 0 : i32
    return %arg0, %c0_i32 : i32, i32
  }
}

</mosaic_0001>

<bundles_post_ra>
// kernel: tpu_custom_call.1
= control target key start
LH: loop header
LB: loop body
LE: loop exit
PB: predicated region body
PF: predicated region fallthrough
CT: control target
= control target key end

     0   :  { %8 = vsyncpa [#allocation3], 0  ;;  %s323_s0 = inlined_call_operand.hbm [shape: f32[8,32], index: 0, kind: input, shape index: {}]   ;;  %s324_s1 = inlined_call_operand.hbm [shape: f32[32,128], index: 1, kind: input, shape index: {}]   ;;  %s325_s2 = inlined_call_operand.vmem [shape: f32[1,128], index: 2, kind: input, shape index: {}]   ;;  %s326_s3 = inlined_call_operand.hbm [shape: f32[8,5], index: 3, kind: output, shape index: {}]  }
   0x1   :  { %9 = vsyncpa [#allocation6], 0 }
   0x2   :  { %10 = vsyncpa [#allocation4], 0  ;;  %s249_s12 = smov [#allocation2]   ;;  %s250_s14 = smov [#allocation5]  }
   0x3   :  { %s17_s13 = sshll.u32 %s249_s12, 4  ;;  %s26_s15 = sshll.u32 %s250_s14, 4  ;;  %s18_s13 = int_to_ptr.vmem [resolvable:$true] %s17_s13  ;;  %s277_s15 = int_to_ptr.vmem [resolvable:$true] %s26_s15 }
   0x4   :  { %s177_s18 = scalar_lea.hbm %s323_s0, 128 }
   0x5   :  { %p178_p0 = scmp.ne.s32.totalorder %s323_s0, %s177_s18  ;;  %p181_p1 = scmp.lt.u32.totalorder %s177_s18, %s323_s0 }
   0x7   :  { %p183_p2 = pnand %p181_p1, %p178_p0 }
   0x9   :  { %186 = shalt.err (!%p183_p2)
}
   0xa   :  { %s187_s23 = scalar_lea.vmem %s18_s13, 128  ;;  %p192_p4 = scmp.lt.s32.totalorder %s18_s13, %s18_s13 }
   0xb   :  { %p188_p3 = scmp.ne.s32.totalorder %s18_s13, %s187_s23  ;;  %p193_p5 = scmp.lt.s32.totalorder %s187_s23, %s187_s23 }
   0xd   :  { %p194_p6 = por %p193_p5, %p192_p4 }
   0xf   :  { %p195_p7 = pnand %p194_p6, %p188_p3 }
  0x11   :  { %198 = shalt.err (!%p195_p7)
}
  0x12   :  { %20 = dma.hbm_to_vmem [thread:$0]  %s323_s0, 128, %s18_s13, [#allocation3]  }
  0x13   :  { %s199_s28 = scalar_lea.hbm %s324_s1, 512 }
  0x14   :  { %p200_p8 = scmp.ne.s32.totalorder %s324_s1, %s199_s28  ;;  %p203_p9 = scmp.lt.u32.totalorder %s199_s28, %s324_s1 }
  0x16   :  { %p205_p10 = pnand %p203_p9, %p200_p8 }
  0x18   :  { %208 = shalt.err (!%p205_p10)
}
  0x19   :  { %s209_s6 = scalar_lea.vmem %s277_s15, 512  ;;  %p214_p12 = scmp.lt.s32.totalorder %s277_s15, %s277_s15 }
  0x1a   :  { %p210_p11 = scmp.ne.s32.totalorder %s277_s15, %s209_s6  ;;  %p215_p13 = scmp.lt.s32.totalorder %s209_s6, %s209_s6 }
  0x1c   :  { %p216_p0 = por %p215_p13, %p214_p12 }
  0x1e   :  { %p217_p1 = pnand %p216_p0, %p210_p11 }
  0x20   :  { %220 = shalt.err (!%p217_p1)
}
  0x21   :  { %s251_s0 = smov 128   ;;  %s252_s7 = smov 8  }
  0x22   :  { %32 = dma.hbm_to_vmem [thread:$0]  %s324_s1, 512, %s277_s15, [#allocation6], %s251_s0, %s251_s0, %s252_s7  }
  0x23   :  { %243 = dma.done.wait [#allocation3], 128  }
  0x24   :  { %244 = vsyncadd [#allocation3], 4294967168 }
  0x25   :  { %245 = dma.done.wait [#allocation6], 512  }
  0x26   :  { %246 = vsyncadd [#allocation6], 4294966784  ;;  %v253_v0 = vmov 0.0|0.0   ;;  %vm254_vm0 = vmmov 0   ;;  %v255_v1 = vmov 0.0   ;;  %v42_v2 = vld [vmem:[#allocation5] sm:$0xff] }
  0x27   :  { %163 = vmatprep.subr.bf16.mxu0 %v253_v0  ;;  %160 = vmatprep.mubr.msk.f32.mxu0 %vm254_vm0, %v255_v1  ;;  %v43_v3 = vld [vmem:[#allocation5 + $0x8] sm:$0xff]  ;;  %v44_v4 = vld [vmem:[#allocation5 + $0x10] sm:$0xff]  ;;  %v45_v6 = vld [vmem:[#allocation5 + $0x18] sm:$0xff]  ;;  %vm53_vm1 = vcmask 261120   ;;  %s256_s11 = smov [#allocation7]   ;;  %vm127_vm2 = vcmask 39936  }
  0x28   :  { %v164_v5 = vpack.c.bf16 %v43_v3, %v42_v2  ;;  %v167_v7 = vpack.c.bf16 %v45_v6, %v44_v4  ;;  %v41_v8 = vld [vmem:[#allocation2] sm:$0xff]  ;;  %s135_s12 = sshll.u32 %s256_s11, 4  ;;  %s136_s12 = int_to_ptr.vmem [resolvable:$true] %s135_s12 }
  0x29   :  { %v145_v9 = vld [vmem:[%s325_s2] ss:$0 sm:$0xff]  ;;  %s221_s13 = scalar_lea.vmem %s136_s12, 128  ;;  %p226_p3 = scmp.lt.s32.totalorder %s136_s12, %s136_s12 }
  0x2a   :  { %165 = vmatpush3.bf16.msra.mxu0 %v164_v5  ;;  %p222_p2 = scmp.ne.s32.totalorder %s136_s12, %s221_s13  ;;  %p227_p4 = scmp.lt.s32.totalorder %s221_s13, %s221_s13 }
  0x2b   :  { %166 = vmatprep.subr.bf16.mxu0 %v253_v0 }
  0x2c   :  { %p228_p5 = por %p227_p4, %p226_p3 }
  0x2e   :  { %168 = vmatpush3.bf16.msra.mxu0 %v167_v7  ;;  %p229_p6 = pnand %p228_p5, %p222_p2 }
  0x31   :  { %161 = vmatmul.mubr.msk.f32.vlgmr.msra.gmra.mrb[0].mxu0 %vm53_vm1, %v41_v8 }
 0x104   :  { %v123_v10 = vpop.f32.mrb[0].mxu0 }
 0x105   :  { %v124_v11 = vadd.f32 %v145_v9, %v123_v10  ;;  %v162_v12 = vpop.f32.mrb[1].mxu0 }
 0x107   :  { %128 = vst.msk [vmem:[#allocation7] sm:$0xff] %vm127_vm2, %v124_v11 }
 0x108   :  { %232 = shalt.err (!%p229_p6)
}
 0x109   :  { %s233_s16 = scalar_lea.hbm %s326_s3, 128 }
 0x10a   :  { %p234_p7 = scmp.ne.s32.totalorder %s326_s3, %s233_s16  ;;  %p237_p8 = scmp.lt.u32.totalorder %s233_s16, %s326_s3 }
 0x10c   :  { %p239_p9 = pnand %p237_p8, %p234_p7 }
 0x10e   :  { %242 = shalt.err (!%p239_p9)
}
 0x10f   :  { %138 = dma.vmem_to_hbm [thread:$0]  %s136_s12, 128, %s326_s3, [#allocation4]  }
 0x110   :  { %247 = dma.done.wait [#allocation4], 128  }
 0x111   :  { %248 = vsyncadd [#allocation4], 4294967168 }
 0x112   :  { %142 = vsyncpa [#allocation3], 1 }
 0x113   :  { %143 = vsyncpa [#allocation6], 1 }
 0x114   :  { %144 = vsyncpa [#allocation4], 1 }

</bundles_post_ra>
